<compile_context>
chip_gen: v7x
topology: tpu7x:2x2x1
jax: 0.10.0
libtpu: 0.0.40
codegen_flags: <defaults>
</compile_context>

<pallas_src>
import jax
import jax.numpy as jnp
from jax import lax
from jax.experimental import pallas as pl
from jax.experimental.pallas import tpu as pltpu

_OUT_DIM = 4                      # true Linear output width
_OUT_PAD = 8                      # sublane-aligned output rows (rows 4..7 = 0)
_LANE = 128                       # lane alignment for the batch tile
_MAX_TB = 8192                    # hard cap on the batch tile
_X_VMEM_BUDGET = 24 * 1024 * 1024  # budget for the double-buffered x tiles
_VMEM_LIMIT = 40 * 1024 * 1024     # explicit scoped-VMEM limit (safe on v5e/v6e/v7x)


def _round_up(x, m):
    return ((x + m - 1) // m) * m


def _pick_batch_tile(B, D):
    """Largest lane-aligned batch tile whose double-buffered x DMA fits the budget."""
    cap = max(_LANE, (_X_VMEM_BUDGET // (2 * D * 4)) // _LANE * _LANE)
    return min(_round_up(B, _LANE), cap, _MAX_TB)


def prepare_params(weight, bias):
    """One-time padding of torch-layout Linear params; hoist out of the hot path."""
    D = weight.shape[1]
    w8 = jnp.zeros((_OUT_PAD, D), dtype=weight.dtype).at[:_OUT_DIM, :].set(weight)
    b8 = jnp.zeros((_OUT_PAD, 1), dtype=bias.dtype).at[:_OUT_DIM, 0].set(bias)
    return w8, b8


def _rotation_predictor_kernel(x_ref, w_ref, b_ref, o_ref):
    # x_ref: [tb, D], w_ref: [8, D], b_ref: [8, 1], o_ref: [8, tb]
    # z[n, b] = sum_d W[n, d] * x[b, d]   (both operands contract on their last dim,
    # the natively supported transposed-RHS MXU form, same as q @ k^T in flash attn).
    z = lax.dot_general(
        w_ref[...], x_ref[...],
        dimension_numbers=(((1,), (1,)), ((), ())),
        preferred_element_type=jnp.float32,
    )
    o_ref[...] = jax.nn.sigmoid(z + b_ref[...]).astype(o_ref.dtype)


@jax.jit
def rotation_predictor_prepared(x, w8, b8):
    """x: [B, P, P] f32; w8: [8, P*P] (rows 4..7 zero); b8: [8, 1]."""
    B = x.shape[0]
    D = x.shape[1] * x.shape[2]
    x_flat = x.reshape(B, D)                     # == torch .view(B, -1), no copy

    tb = _pick_batch_tile(B, D)
    num_blocks = pl.cdiv(B, tb)                  # ragged last block; no jnp.pad of x
    n_lanes = num_blocks * tb                    # output lane extent (exactly tiled)

    out_t = pl.pallas_call(
        _rotation_predictor_kernel,
        out_shape=jax.ShapeDtypeStruct((_OUT_PAD, n_lanes), jnp.float32),
        grid_spec=pl.GridSpec(
            grid=(num_blocks,),
            in_specs=[
                pl.BlockSpec((tb, D), lambda i: (i, 0)),        # x tile (pipelined)
                pl.BlockSpec((_OUT_PAD, D), lambda i: (0, 0)),  # weight, resident
                pl.BlockSpec((_OUT_PAD, 1), lambda i: (0, 0)),  # bias, resident
            ],
            out_specs=pl.BlockSpec((_OUT_PAD, tb), lambda i: (0, i)),
        ),
        compiler_params=pltpu.CompilerParams(
            dimension_semantics=("parallel",),   # batch axis can split across TCs
            vmem_limit_bytes=_VMEM_LIMIT,
        ),
        cost_estimate=pl.CostEstimate(
            flops=2 * B * D * _OUT_PAD,
            transcendentals=B * _OUT_PAD,
            bytes_accessed=(B * D * 4                 # x read (dominant)
                            + _OUT_PAD * D * 4        # weight
                            + _OUT_PAD * 4            # bias
                            + n_lanes * _OUT_PAD * 4  # transposed output write
                            ),
        ),
    )(x_flat, w8, b8)

    # [8, n_lanes] -> [B, 4]: drop the zero-weight rows and the ragged batch tail.
    return out_t[:_OUT_DIM, :B].T


def rotation_predictor(x, weight, bias):
    """Convenience wrapper matching the torch module: weight [4, P*P], bias [4]."""
    w8, b8 = prepare_params(weight, bias)
    return rotation_predictor_prepared(x, w8, b8)


if __name__ == "__main__":
    key = jax.random.PRNGKey(0)
    kx, kw, kb = jax.random.split(key, 3)

    pose_size = 16
    B = 2

    x = jax.random.normal(kx, (B, pose_size, pose_size), dtype=jnp.float32)
    D = pose_size * pose_size
    # Mimic torch Linear default init scale (uniform in +-1/sqrt(D)).
    bound = 1.0 / jnp.sqrt(jnp.float32(D))
    weight = jax.random.uniform(kw, (4, D), minval=-bound, maxval=bound,
                                dtype=jnp.float32)
    bias = jax.random.uniform(kb, (4,), minval=-bound, maxval=bound,
                              dtype=jnp.float32)

    out = rotation_predictor(x, weight, bias)
    out = jax.block_until_ready(out)

    # Reference check in plain JAX.
    ref = jax.nn.sigmoid(x.reshape(B, -1) @ weight.T + bias)
    assert out.shape == (B, 4)
    assert jnp.allclose(out, ref, atol=1e-5, rtol=1e-5)

    print("KERNEL_OK")
</pallas_src>

<mosaic_0001>
module attributes {stable_mosaic.version = 11 : i64} {
  func.func @_rotation_predictor_kernel(%arg0: i32, %arg1: memref<128x256xf32, #tpu.memory_space<vmem>>, %arg2: memref<8x256xf32, #tpu.memory_space<vmem>>, %arg3: memref<8x1xf32, #tpu.memory_space<vmem>>, %arg4: memref<8x128xf32, #tpu.memory_space<vmem>>) attributes {dimension_semantics = [#tpu.dimension_semantics<parallel>], iteration_bounds = array<i64: 1>, scalar_prefetch = 0 : i64, scratch_operands = 0 : i64, tpu.core_type = #tpu.core_type<tc>, window_params = [{transform_indices = @transform_0, window_bounds = array<i64: 128, 256>}, {pipeline_mode = #tpu.pipeline_mode<synchronous>, transform_indices = @transform_1, window_bounds = array<i64: 8, 256>}, {pipeline_mode = #tpu.pipeline_mode<synchronous>, transform_indices = @transform_2, window_bounds = array<i64: 8, 1>}, {transform_indices = @transform_3, window_bounds = array<i64: 8, 128>}]} {
    %c0 = arith.constant 0 : index
    %c0_0 = arith.constant 0 : index
    %0 = vector.load %arg2[%c0, %c0_0] : memref<8x256xf32, #tpu.memory_space<vmem>>, vector<8x256xf32>
    %c0_1 = arith.constant 0 : index
    %c0_2 = arith.constant 0 : index
    %1 = vector.load %arg1[%c0_1, %c0_2] : memref<128x256xf32, #tpu.memory_space<vmem>>, vector<128x256xf32>
    %cst = arith.constant dense<0.000000e+00> : vector<8x128xf32>
    %2 = tpu.matmul %0, %1, %cst {dimension_numbers = #tpu.dot_dimension_numbers<[1], [1], [0], [0], [0, 0, 1, 0], [], []>} : vector<8x256xf32>, vector<128x256xf32>, vector<8x128xf32> -> vector<8x128xf32>
    %c0_3 = arith.constant 0 : index
    %c0_4 = arith.constant 0 : index
    %3 = vector.load %arg3[%c0_3, %c0_4] : memref<8x1xf32, #tpu.memory_space<vmem>>, vector<8x1xf32>
    %4 = vector.broadcast %3 : vector<8x1xf32> to vector<8x128xf32>
    %5 = arith.addf %2, %4 : vector<8x128xf32>
    %6 = arith.negf %5 : vector<8x128xf32>
    %7 = math.exp %6 : vector<8x128xf32>
    %cst_5 = arith.constant 1.000000e+00 : f32
    %8 = vector.broadcast %cst_5 : f32 to vector<8x128xf32>
    %9 = arith.addf %8, %7 : vector<8x128xf32>
    %10 = arith.divf %8, %9 : vector<8x128xf32>
    %c0_6 = arith.constant 0 : index
    %c0_7 = arith.constant 0 : index
    %11 = vector.load %arg4[%c0_6, %c0_7] : memref<8x128xf32, #tpu.memory_space<vmem>>, vector<8x128xf32>
    tpu.vector_store %arg4[%c0_6, %c0_7], %10 {strides = array<i32>} : memref<8x128xf32, #tpu.memory_space<vmem>>, vector<8x128xf32>,
    return
  }
  func.func @transform_0(%arg0: i32) -> (i32, i32) {
    %c0_i32 = arith.constant 0 : i32
    %c0_i32_0 = arith.constant 0 : i32
    return %arg0, %c0_i32 : i32, i32
  }
  func.func @transform_1(%arg0: i32) -> (i32, i32) {
    %c0_i32 = arith.constant 0 : i32
    %c0_i32_0 = arith.constant 0 : i32
    %c0_i32_1 = arith.constant 0 : i32
    return %c0_i32, %c0_i32_0 : i32, i32
  }
  func.func @transform_2(%arg0: i32) -> (i32, i32) {
    %c0_i32 = arith.constant 0 : i32
    %c0_i32_0 = arith.constant 0 : i32
    %c0_i32_1 = arith.constant 0 : i32
    return %c0_i32, %c0_i32_0 : i32, i32
  }
  func.func @transform_3(%arg0: i32) -> (i32, i32) {
    %c0_i32 = arith.constant 0 : i32
    %c0_i32_0 = arith.constant 0 : i32
    return %c0_i32, %arg0 : i32, i32
  }
}

</mosaic_0001>

<bundles_post_ra>
// kernel: rotation_predictor_prepared.1
= control target key start
LH: loop header
LB: loop body
LE: loop exit
PB: predicated region body
PF: predicated region fallthrough
CT: control target
= control target key end

     0   :  { %v655_v0 = vmov 0   ;;  %s784_s0 = inlined_call_operand.vmem [shape: f32[2,256], index: 0, kind: input, shape index: {}]   ;;  %s785_s1 = inlined_call_operand.vmem [shape: f32[8,256], index: 1, kind: input, shape index: {}]   ;;  %s786_s2 = inlined_call_operand.vmem [shape: f32[8,1], index: 2, kind: input, shape index: {}]   ;;  %s787_s3 = inlined_call_operand.vmem [shape: f32[8,128], index: 3, kind: output, shape index: {}]  }
   0x1   :  { %586 = vset.pattern.permute.xlu0 %v655_v0  ;;  %v623_v1 = vld.sshfl [vmem:[%s784_s0] sm:$0xff pattern:$0x76325410]  ;;  %v624_v2 = vld.sshfl [vmem:[%s784_s0 + $0x8] sm:$0xff pattern:$0x76325410] }
   0x2   :  { %v625_v3 = vld.sshfl [vmem:[%s784_s0 + $0x10] sm:$0xff pattern:$0x76325410]  ;;  %v626_v4 = vld.sshfl [vmem:[%s784_s0 + $0x18] sm:$0xff pattern:$0x76325410]  ;;  %v167_v9 = vcombine.high %v623_v1, %v624_v2  ;;  %v166_v11 = vcombine.low %v623_v1, %v624_v2 }
   0x3   :  { %v627_v5 = vld.sshfl [vmem:[%s784_s0 + $0x20] sm:$0xff pattern:$0x76325410]  ;;  %v628_v6 = vld.sshfl [vmem:[%s784_s0 + $0x28] sm:$0xff pattern:$0x76325410]  ;;  %v185_v10 = vcombine.high %v625_v3, %v626_v4  ;;  %v184_v12 = vcombine.low %v625_v3, %v626_v4 }
   0x4   :  { %v629_v7 = vld.sshfl [vmem:[%s784_s0 + $0x30] sm:$0xff pattern:$0x76325410]  ;;  %v630_v8 = vld.sshfl [vmem:[%s784_s0 + $0x38] sm:$0xff pattern:$0x76325410]  ;;  %v203_v16 = vcombine.high %v627_v5, %v628_v6  ;;  %v202_v21 = vcombine.low %v627_v5, %v628_v6 }
   0x5   :  { %v552_v13 = vpack.c.bf16 %v185_v10, %v167_v9  ;;  %v554_v14 = vpack.c.bf16 %v184_v12, %v166_v11  ;;  %v631_v15 = vld.sshfl [vmem:[%s784_s0 + $0x40] sm:$0xff pattern:$0x76325410]  ;;  %v221_v17 = vcombine.high %v629_v7, %v630_v8  ;;  %v632_v18 = vld.sshfl [vmem:[%s784_s0 + $0x48] sm:$0xff pattern:$0x76325410]  ;;  %v220_v23 = vcombine.low %v629_v7, %v630_v8 }
   0x6   :  { %v633_v19 = vld.sshfl [vmem:[%s784_s0 + $0x50] sm:$0xff pattern:$0x76325410]  ;;  %v634_v20 = vld.sshfl [vmem:[%s784_s0 + $0x58] sm:$0xff pattern:$0x76325410]  ;;  %v239_v25 = vcombine.high %v631_v15, %v632_v18  ;;  %v238_v35 = vcombine.low %v631_v15, %v632_v18 }
   0x7   :  { %553 = vmatprep.subr.bf16.mxu0 %v552_v13  ;;  %v556_v22 = vpack.c.bf16 %v221_v17, %v203_v16  ;;  %v635_v24 = vld.sshfl [vmem:[%s784_s0 + $0x60] sm:$0xff pattern:$0x76325410]  ;;  %v636_v26 = vld.sshfl [vmem:[%s784_s0 + $0x68] sm:$0xff pattern:$0x76325410]  ;;  %v257_v29 = vcombine.high %v633_v19, %v634_v20  ;;  %v558_v30 = vpack.c.bf16 %v220_v23, %v202_v21  ;;  %v256_v36 = vcombine.low %v633_v19, %v634_v20 }
   0x8   :  { %555 = vmatpush1.bf16.xpose.msra.mxu0 %v554_v14  ;;  %v637_v27 = vld.sshfl [vmem:[%s784_s0 + $0x70] sm:$0xff pattern:$0x76325410]  ;;  %v638_v28 = vld.sshfl [vmem:[%s784_s0 + $0x78] sm:$0xff pattern:$0x76325410]  ;;  %v275_v37 = vcombine.high %v635_v24, %v636_v26  ;;  %v274_v45 = vcombine.low %v635_v24, %v636_v26 }
   0x9   :  { %557 = vmatprep.subr.bf16.mxu0 %v556_v22  ;;  %v560_v31 = vpack.c.bf16 %v257_v29, %v239_v25  ;;  %v639_v32 = vld.sshfl [vmem:[%s784_s0 + $0x80] sm:$0xff pattern:$0x76325410]  ;;  %v640_v33 = vld.sshfl [vmem:[%s784_s0 + $0x88] sm:$0xff pattern:$0x76325410]  ;;  %v293_v38 = vcombine.high %v637_v27, %v638_v28  ;;  %v562_v40 = vpack.c.bf16 %v256_v36, %v238_v35  ;;  %v292_v46 = vcombine.low %v637_v27, %v638_v28 }
   0xa   :  { %v641_v34 = vld.sshfl [vmem:[%s784_s0 + $0x90] sm:$0xff pattern:$0x76325410]  ;;  %v642_v39 = vld.sshfl [vmem:[%s784_s0 + $0x98] sm:$0xff pattern:$0x76325410]  ;;  %v311_v47 = vcombine.high %v639_v32, %v640_v33  ;;  %v310_v54 = vcombine.low %v639_v32, %v640_v33 }
   0xb   :  { %v564_v41 = vpack.c.bf16 %v293_v38, %v275_v37  ;;  %v643_v42 = vld.sshfl [vmem:[%s784_s0 + $0xa0] sm:$0xff pattern:$0x76325410]  ;;  %v644_v43 = vld.sshfl [vmem:[%s784_s0 + $0xa8] sm:$0xff pattern:$0x76325410]  ;;  %v329_v48 = vcombine.high %v641_v34, %v642_v39  ;;  %v566_v52 = vpack.c.bf16 %v292_v46, %v274_v45  ;;  %v328_v55 = vcombine.low %v641_v34, %v642_v39 }
   0xc   :  { %v645_v44 = vld.sshfl [vmem:[%s784_s0 + $0xb0] sm:$0xff pattern:$0x76325410]  ;;  %v646_v49 = vld.sshfl [vmem:[%s784_s0 + $0xb8] sm:$0xff pattern:$0x76325410]  ;;  %v347_v57 = vcombine.high %v643_v42, %v644_v43  ;;  %v346_v0 = vcombine.low %v643_v42, %v644_v43 }
   0xd   :  { %v15_v50 = vld [vmem:[%s785_s1 + $0x8] sm:$0xff]  ;;  %v80_v51 = vld [vmem:[%s786_s2] sm:$0xff]  ;;  %v568_v53 = vpack.c.bf16 %v329_v48, %v311_v47  ;;  %v365_v58 = vcombine.high %v645_v44, %v646_v49  ;;  %v649_v60 = vld.sshfl [vmem:[%s784_s0 + $0xd0] sm:$0xff pattern:$0x76325410]  ;;  %v570_v62 = vpack.c.bf16 %v328_v55, %v310_v54  ;;  %v364_v1 = vcombine.low %v645_v44, %v646_v49 }
   0xe   :  { %534 = vmatprep.mubr.f32.mxu0 %v15_v50  ;;  %83 = vperm.xlu0 %586, %v80_v51   ;;  %v647_v56 = vld.sshfl [vmem:[%s784_s0 + $0xc0] sm:$0xff pattern:$0x76325410]  ;;  %v648_v59 = vld.sshfl [vmem:[%s784_s0 + $0xc8] sm:$0xff pattern:$0x76325410] }
   0xf   :  { %v650_v61 = vld.sshfl [vmem:[%s784_s0 + $0xd8] sm:$0xff pattern:$0x76325410]  ;;  %v572_v63 = vpack.c.bf16 %v365_v58, %v347_v57  ;;  %v651_v2 = vld.sshfl [vmem:[%s784_s0 + $0xe0] sm:$0xff pattern:$0x76325410]  ;;  %v383_v3 = vcombine.high %v647_v56, %v648_v59  ;;  %v574_v8 = vpack.c.bf16 %v364_v1, %v346_v0  ;;  %v382_v10 = vcombine.low %v647_v56, %v648_v59 }
  0x10   :  { %559 = vmatpush1.bf16.xpose.msra.mxu0 %v558_v30  ;;  %v401_v4 = vcombine.high %v649_v60, %v650_v61  ;;  %v652_v5 = vld.sshfl [vmem:[%s784_s0 + $0xe8] sm:$0xff pattern:$0x76325410]  ;;  %v653_v6 = vld.sshfl [vmem:[%s784_s0 + $0xf0] sm:$0xff pattern:$0x76325410]  ;;  %v400_v11 = vcombine.low %v649_v60, %v650_v61 }
  0x11   :  { %561 = vmatprep.subr.bf16.mxu0 %v560_v31  ;;  %v654_v7 = vld.sshfl [vmem:[%s784_s0 + $0xf8] sm:$0xff pattern:$0x76325410]  ;;  %v419_v12 = vcombine.high %v651_v2, %v652_v5  ;;  %v418_v16 = vcombine.low %v651_v2, %v652_v5  ;;  %v14_v19 = vld [vmem:[%s785_s1] sm:$0xff] }
  0x12   :  { %v576_v9 = vpack.c.bf16 %v401_v4, %v383_v3  ;;  %v437_v13 = vcombine.high %v653_v6, %v654_v7  ;;  %v578_v14 = vpack.c.bf16 %v400_v11, %v382_v10  ;;  %v436_v17 = vcombine.low %v653_v6, %v654_v7 }
  0x14   :  { %v580_v15 = vpack.c.bf16 %v437_v13, %v419_v12  ;;  %v582_v18 = vpack.c.bf16 %v436_v17, %v418_v16 }
  0x18   :  { %563 = vmatpush1.bf16.xpose.msra.mxu0 %v562_v40 }
  0x19   :  { %565 = vmatprep.subr.bf16.mxu0 %v564_v41 }
  0x20   :  { %567 = vmatpush1.bf16.xpose.msra.mxu0 %v566_v52 }
  0x21   :  { %569 = vmatprep.subr.bf16.mxu0 %v568_v53 }
  0x28   :  { %571 = vmatpush1.bf16.xpose.msra.mxu0 %v570_v62 }
  0x29   :  { %573 = vmatprep.subr.bf16.mxu0 %v572_v63 }
  0x30   :  { %575 = vmatpush1.bf16.xpose.msra.mxu0 %v574_v8 }
  0x31   :  { %577 = vmatprep.subr.bf16.mxu0 %v576_v9 }
  0x38   :  { %579 = vmatpush1.bf16.xpose.msra.mxu0 %v578_v14 }
  0x39   :  { %581 = vmatprep.subr.bf16.mxu0 %v580_v15 }
  0x40   :  { %583 = vmatpush1.bf16.xpose.msra.mxu0 %v582_v18 }
  0x47   :  { %535 = vmatmul.mubr.f32.vlgmr.msra.gmra.mrb[0].mxu0 %v14_v19 }
  0x8d   :  { %v84_v20 = vpop.permute.xlu0 %83 }
 0x11a   :  { %v536_v21 = vpop.f32.mrb[0].mxu0 }
 0x11b   :  { %v537_v22 = vadd.f32 %v536_v21, %v84_v20  ;;  %v538_v23 = vpop.f32.mrb[1].mxu0 }
 0x11d   :  { %v551_v24 = vmul.f32 -1.442695, %v537_v22 }
 0x11f   :  { %619 = vpow2.f32 %v551_v24 }
 0x129   :  { %v620_v25 = vpop.eup %619 }
 0x12a   :  { %v543_v26 = vadd.f32 1.0, %v620_v25 }
 0x12c   :  { %621 = vrcp.f32 %v543_v26 }
 0x136   :  { %v622_v27 = vpop.eup %621 }
 0x137   :  { %546 = vst [vmem:[%s787_s3] sm:$0xff] %v622_v27 }

</bundles_post_ra>
